<compile_context>
chip_gen: v5e
topology: v5e:2x2
jax: 0.10.0
libtpu: 0.0.40
codegen_flags: <defaults>
</compile_context>

<pallas_src>
import functools

import jax
import jax.numpy as jnp
from jax import lax
from jax.experimental import pallas as pl
from jax.experimental.pallas import tpu as pltpu

EPS = 1e-5  # PyTorch nn.LayerNorm default eps


# ---------------------------------------------------------------------------
# Fused kernel: conv1 + LN1 + ReLU + depthwise conv2 + LN2 + ReLU (one tile)
# ---------------------------------------------------------------------------
def _sepconv_fused_kernel(cols_ref, w1e_ref, b1_ref, g1_ref, bt1_ref,
                          sel_ref, w2l_ref, b2_ref, g2_ref, bt2_ref,
                          out_ref, *, b_tile, F, out_F, C2, k):
    # cols_ref : (b_tile*F, K1p)           im2col patches, rows = (b, f)
    # w1e_ref  : (K1p, C2)                 conv1 weight expanded with I_{out_T}
    # b1_ref   : (1, C2)                   conv1 bias, repeated over time lanes
    # g1_ref   : (F, C2)   bt1_ref: (F, C2)        LayerNorm1 gamma / beta
    # sel_ref  : (b_tile*out_F, k*b_tile*F)  block-diagonal 0/1 tap selection
    # w2l_ref  : (k, C2)                   depthwise weights per tap, lane vecs
    # b2_ref   : (1, C2)                   conv2 bias
    # g2_ref   : (out_F, C2) bt2_ref: (out_F, C2)  LayerNorm2 gamma / beta
    # out_ref  : (b_tile*out_F, C2)        rows = (b, f_out), lanes = (oc, t)

    # ---- stage 1: one MXU matmul for the whole batch tile -----------------
    y1 = jnp.dot(cols_ref[...], w1e_ref[...],
                 preferred_element_type=jnp.float32) + b1_ref[...]

    # ---- LN1 + ReLU, statistics batched over the tile ----------------------
    n1 = float(F * C2)
    y1_3d = y1.reshape(b_tile, F, C2)
    s1_ = jnp.sum(jnp.sum(y1_3d, axis=2, keepdims=True), axis=1, keepdims=True)
    mean1 = s1_ / n1
    yc1 = y1_3d - mean1
    v1_ = jnp.sum(jnp.sum(yc1 * yc1, axis=2, keepdims=True),
                  axis=1, keepdims=True)
    inv1 = lax.rsqrt(v1_ / n1 + EPS)
    a1 = jnp.maximum(yc1 * inv1 * g1_ref[...][None] + bt1_ref[...][None], 0.0)
    a1_slab = a1.reshape(b_tile * F, C2)

    # ---- stage 2: depthwise conv along F, batched as ONE matmul -----------
    # rhs rows are ordered (dk, b, f); sel is block-diagonal over b and picks
    # f = f_out*s1 + dk - pad_top (zeros implement the F zero padding).
    w2l = w2l_ref[...]
    rhs = jnp.concatenate([a1_slab * w2l[dk:dk + 1, :] for dk in range(k)],
                          axis=0)                              # (k*b_tile*F, C2)
    y2 = jnp.dot(sel_ref[...], rhs,
                 preferred_element_type=jnp.float32) + b2_ref[...]

    # ---- LN2 + ReLU, batched stats -----------------------------------------
    n2 = float(out_F * C2)
    y2_3d = y2.reshape(b_tile, out_F, C2)
    s2_ = jnp.sum(jnp.sum(y2_3d, axis=2, keepdims=True), axis=1, keepdims=True)
    mean2 = s2_ / n2
    yc2 = y2_3d - mean2
    v2_ = jnp.sum(jnp.sum(yc2 * yc2, axis=2, keepdims=True),
                  axis=1, keepdims=True)
    inv2 = lax.rsqrt(v2_ / n2 + EPS)
    a2 = jnp.maximum(yc2 * inv2 * g2_ref[...][None] + bt2_ref[...][None], 0.0)

    # Single store of the whole tile slab.
    out_ref[...] = a2.reshape(b_tile * out_F, C2).astype(out_ref.dtype)


def _pick_b_tile(N, F, out_F, max_b_tile=16):
    """Pick the batch tile.

    Largest tile <= max_b_tile that (a) keeps >= 2 grid steps when N >= 2 (so
    v7x's two TensorCores both get work via the 'parallel' grid axis) and (b)
    keeps the block sublane counts 8-aligned.  The caller pads N up to a
    multiple of the returned tile (no giant-unroll fallback)."""
    hi = max(1, min(max_b_tile, N // 2)) if N >= 2 else 1
    for bt in range(hi, 0, -1):
        if (bt * F) % 8 == 0 and (bt * out_F) % 8 == 0:
            return bt
    for bt in range(hi + 1, 9):           # always succeeds by bt == 8
        if (bt * F) % 8 == 0 and (bt * out_F) % 8 == 0:
            return bt
    return 8


# ---------------------------------------------------------------------------
# Wrapper: host-side glue (padding, im2col, parameter repack) + pallas_call
# ---------------------------------------------------------------------------
def sepconv_block(x, params, *, k, s, in_F, in_T, b_tile=None):
    (W1, b1, g1, bt1, W2, b2, g2, bt2) = params
    N, i_ch, F, T = x.shape
    assert (F, T) == (in_F, in_T)
    s0, s1 = s
    o = W1.shape[0]
    out_T = (in_T - 1) // s0 + 1
    out_F = (in_F - 1) // s1 + 1
    C2 = o * out_T
    K1 = i_ch * k * out_T
    K1p = ((K1 + 127) // 128) * 128          # lane-align the contraction

    if b_tile is None:
        b_tile = _pick_b_tile(N, F, out_F)
    N_pad = ((N + b_tile - 1) // b_tile) * b_tile
    num_steps = N_pad // b_tile

    x32 = x.astype(jnp.float32)

    # ----- stage-1 im2col patches: rows = (b, f), lanes = (ci, dk, t) -----
    # TODO(synk): at realistic T fold the im2col into the kernel (per-tap
    # strided reads / scalar-prefetch index maps) instead of materializing it.
    pad1 = (in_T - 1) // s0 * s0 + k - in_T
    xp = jnp.pad(x32, ((0, 0), (0, 0), (0, 0), (pad1 // 2, pad1 - pad1 // 2)))
    span = (out_T - 1) * s0 + 1
    taps = jnp.stack([xp[:, :, :, dk:dk + span:s0] for dk in range(k)], axis=2)
    cols = jnp.transpose(taps, (0, 3, 1, 2, 4)).reshape(N, F, K1)
    cols = jnp.pad(cols, ((0, N_pad - N), (0, 0), (0, K1p - K1)))
    cols2d = cols.reshape(N_pad * F, K1p)

    # ----- repacked parameters (one-time constants, resident in VMEM) -----
    eye_t = jnp.eye(out_T, dtype=jnp.float32)
    w1r = W1.reshape(o, i_ch * k).astype(jnp.float32)          # (o, i*k)
    # W1exp[(c, t), (oc, t')] = W1r[oc, c] * (t == t')   (outer product, exact)
    w1e = jnp.einsum('co,tu->ctou', w1r.T, eye_t).reshape(K1, C2)
    w1e = jnp.pad(w1e, ((0, K1p - K1), (0, 0)))
    b1_l = jnp.repeat(b1.astype(jnp.float32), out_T).reshape(1, C2)
    g1_F = jnp.transpose(g1.astype(jnp.float32), (1, 0, 2)).reshape(F, C2)
    bt1_F = jnp.transpose(bt1.astype(jnp.float32), (1, 0, 2)).reshape(F, C2)

    pad2 = (in_F - 1) // s1 * s1 + k - in_F
    p2_top = pad2 // 2
    # Per-sample 0/1 selection: sel_small[f_out, dk, f] = 1 iff
    # f == f_out*s1 + dk - p2_top (out-of-range taps -> 0 == zero padding).
    f_out_idx = jnp.arange(out_F)[:, None, None]
    dk_idx = jnp.arange(k)[None, :, None]
    f_idx = jnp.arange(F)[None, None, :]
    sel_small = (f_idx == (f_out_idx * s1 + dk_idx - p2_top)).astype(jnp.float32)
    # Block-diagonal over the batch tile so stage 2 is ONE matmul per step:
    # rows = (b, f_out), cols = (dk, b, f).
    eye_b = jnp.eye(b_tile, dtype=jnp.float32)
    sel_all = jnp.einsum('ab,okf->aokbf', eye_b, sel_small)
    sel_all = sel_all.reshape(b_tile * out_F, k * b_tile * F)

    w2l = jnp.repeat(W2.astype(jnp.float32).T[:, :, None], out_T,
                     axis=2).reshape(k, C2)
    b2_l = jnp.repeat(b2.astype(jnp.float32), out_T).reshape(1, C2)
    g2_F = jnp.transpose(g2.astype(jnp.float32), (1, 0, 2)).reshape(out_F, C2)
    bt2_F = jnp.transpose(bt2.astype(jnp.float32), (1, 0, 2)).reshape(out_F, C2)

    kernel = functools.partial(_sepconv_fused_kernel, b_tile=b_tile, F=F,
                               out_F=out_F, C2=C2, k=k)

    out2d = pl.pallas_call(
        kernel,
        out_shape=jax.ShapeDtypeStruct((N_pad * out_F, C2), jnp.float32),
        grid=(num_steps,),
        in_specs=[
            pl.BlockSpec((b_tile * F, K1p), lambda n: (n, 0)),   # per-step patches
            pl.BlockSpec((K1p, C2), lambda n: (0, 0)),           # resident constants:
            pl.BlockSpec((1, C2), lambda n: (0, 0)),
            pl.BlockSpec((F, C2), lambda n: (0, 0)),
            pl.BlockSpec((F, C2), lambda n: (0, 0)),
            pl.BlockSpec((b_tile * out_F, k * b_tile * F), lambda n: (0, 0)),
            pl.BlockSpec((k, C2), lambda n: (0, 0)),
            pl.BlockSpec((1, C2), lambda n: (0, 0)),
            pl.BlockSpec((out_F, C2), lambda n: (0, 0)),
            pl.BlockSpec((out_F, C2), lambda n: (0, 0)),
        ],
        out_specs=pl.BlockSpec((b_tile * out_F, C2), lambda n: (n, 0)),
        compiler_params=pltpu.CompilerParams(
            dimension_semantics=("parallel",)),
    )(cols2d, w1e, b1_l, g1_F, bt1_F, sel_all, w2l, b2_l, g2_F, bt2_F)

    # rows = (b, f_out), lanes = (oc, t)  ->  (N, o, out_F, out_T)
    out = out2d.reshape(N_pad, out_F, o, out_T)[:N]
    return jnp.transpose(out, (0, 2, 1, 3))


# ---------------------------------------------------------------------------
# Pure-JAX reference (mirrors the PyTorch module) for verification
# ---------------------------------------------------------------------------
def sepconv_block_ref(x, params, *, k, s, in_F, in_T):
    (W1, b1, g1, bt1, W2, b2, g2, bt2) = params
    s0, s1 = s
    o = W1.shape[0]

    def layer_norm(y, g, bt):
        mean = y.mean(axis=(1, 2, 3), keepdims=True)
        var = ((y - mean) ** 2).mean(axis=(1, 2, 3), keepdims=True)
        return (y - mean) / jnp.sqrt(var + EPS) * g[None] + bt[None]

    pad1 = (in_T - 1) // s0 * s0 + k - in_T
    xp = jnp.pad(x, ((0, 0), (0, 0), (0, 0), (pad1 // 2, pad1 - pad1 // 2)))
    y = lax.conv_general_dilated(
        xp, W1[:, :, None, :], window_strides=(1, s0), padding="VALID",
        dimension_numbers=("NCHW", "OIHW", "NCHW"),
        precision=lax.Precision.HIGHEST)
    y = y + b1[None, :, None, None]
    y = jnp.maximum(layer_norm(y, g1, bt1), 0.0)

    pad2 = (in_F - 1) // s1 * s1 + k - in_F
    yp = jnp.pad(y, ((0, 0), (0, 0), (pad2 // 2, pad2 - pad2 // 2), (0, 0)))
    z = lax.conv_general_dilated(
        yp, W2[:, None, :, None], window_strides=(s1, 1), padding="VALID",
        feature_group_count=o, dimension_numbers=("NCHW", "OIHW", "NCHW"),
        precision=lax.Precision.HIGHEST)
    z = z + b2[None, :, None, None]
    z = jnp.maximum(layer_norm(z, g2, bt2), 0.0)
    return z


if __name__ == "__main__":
    # Shapes consistent with the module: i=4, o=8, k=3, s=(2,2), F=T=16.
    i_ch, o, k = 4, 8, 3
    s = (2, 2)
    in_F, in_T = 16, 16
    out_T = (in_T - 1) // s[0] + 1
    out_F = (in_F - 1) // s[1] + 1

    key = jax.random.PRNGKey(0)
    kx, k1, k2, k3, k4, k5, k6, k7, k8 = jax.random.split(key, 9)

    # Deterministic synthetic parameters (shapes match the PyTorch module).
    W1 = 0.1 * jax.random.normal(k1, (o, i_ch, k), jnp.float32)             # conv1.weight (o,i,1,k) squeezed
    b1 = 0.1 * jax.random.normal(k2, (o,), jnp.float32)                      # conv1.bias
    g1 = 1.0 + 0.05 * jax.random.normal(k3, (o, in_F, out_T), jnp.float32)   # ln1.weight
    bt1 = 0.05 * jax.random.normal(k4, (o, in_F, out_T), jnp.float32)        # ln1.bias
    W2 = 0.1 * jax.random.normal(k5, (o, k), jnp.float32)                    # conv2.weight (o,1,k,1) squeezed
    b2 = 0.1 * jax.random.normal(k6, (o,), jnp.float32)                      # conv2.bias
    g2 = 1.0 + 0.05 * jax.random.normal(k7, (o, out_F, out_T), jnp.float32)  # ln2.weight
    bt2 = 0.05 * jax.random.normal(k8, (o, out_F, out_T), jnp.float32)       # ln2.bias
    params = (W1, b1, g1, bt1, W2, b2, g2, bt2)

    fwd = jax.jit(functools.partial(sepconv_block, k=k, s=s,
                                    in_F=in_F, in_T=in_T))

    # N=8 exercises the batched path (b_tile=4, 2 grid steps);
    # N=2 exercises the minimal config (b_tile=1, 2 grid steps).
    for N in (8, 2):
        x = jax.random.normal(kx, (N, i_ch, in_F, in_T), jnp.float32)
        out = jax.block_until_ready(fwd(x, params))
        ref = jax.block_until_ready(
            sepconv_block_ref(x, params, k=k, s=s, in_F=in_F, in_T=in_T))
        assert out.shape == (N, o, out_F, out_T), out.shape
        err = float(jnp.max(jnp.abs(out - ref)))
        assert jnp.allclose(out, ref, atol=1e-3, rtol=1e-3), err

    print("KERNEL_OK")
</pallas_src>

<mosaic_0001>
module attributes {stable_mosaic.version = 11 : i64} {
  func.func @_sepconv_fused_kernel(%arg0: i32, %arg1: memref<64x128xf32, #tpu.memory_space<vmem>>, %arg2: memref<128x64xf32, #tpu.memory_space<vmem>>, %arg3: memref<1x64xf32, #tpu.memory_space<vmem>>, %arg4: memref<16x64xf32, #tpu.memory_space<vmem>>, %arg5: memref<16x64xf32, #tpu.memory_space<vmem>>, %arg6: memref<32x192xf32, #tpu.memory_space<vmem>>, %arg7: memref<3x64xf32, #tpu.memory_space<vmem>>, %arg8: memref<1x64xf32, #tpu.memory_space<vmem>>, %arg9: memref<8x64xf32, #tpu.memory_space<vmem>>, %arg10: memref<8x64xf32, #tpu.memory_space<vmem>>, %arg11: memref<32x64xf32, #tpu.memory_space<vmem>>) attributes {dimension_semantics = [#tpu.dimension_semantics<parallel>], iteration_bounds = array<i64: 2>, scalar_prefetch = 0 : i64, scratch_operands = 0 : i64, tpu.core_type = #tpu.core_type<tc>, window_params = [{transform_indices = @transform_0, window_bounds = array<i64: 64, 128>}, {pipeline_mode = #tpu.pipeline_mode<synchronous>, transform_indices = @transform_1, window_bounds = array<i64: 128, 64>}, {pipeline_mode = #tpu.pipeline_mode<synchronous>, transform_indices = @transform_2, window_bounds = array<i64: 1, 64>}, {pipeline_mode = #tpu.pipeline_mode<synchronous>, transform_indices = @transform_3, window_bounds = array<i64: 16, 64>}, {pipeline_mode = #tpu.pipeline_mode<synchronous>, transform_indices = @transform_4, window_bounds = array<i64: 16, 64>}, {pipeline_mode = #tpu.pipeline_mode<synchronous>, transform_indices = @transform_5, window_bounds = array<i64: 32, 192>}, {pipeline_mode = #tpu.pipeline_mode<synchronous>, transform_indices = @transform_6, window_bounds = array<i64: 3, 64>}, {pipeline_mode = #tpu.pipeline_mode<synchronous>, transform_indices = @transform_7, window_bounds = array<i64: 1, 64>}, {pipeline_mode = #tpu.pipeline_mode<synchronous>, transform_indices = @transform_8, window_bounds = array<i64: 8, 64>}, {pipeline_mode = #tpu.pipeline_mode<synchronous>, transform_indices = @transform_9, window_bounds = array<i64: 8, 64>}, {transform_indices = @transform_10, window_bounds = array<i64: 32, 64>}]} {
    %c0 = arith.constant 0 : index
    %c0_0 = arith.constant 0 : index
    %0 = vector.load %arg1[%c0, %c0_0] : memref<64x128xf32, #tpu.memory_space<vmem>>, vector<64x128xf32>
    %c0_1 = arith.constant 0 : index
    %c0_2 = arith.constant 0 : index
    %1 = vector.load %arg2[%c0_1, %c0_2] : memref<128x64xf32, #tpu.memory_space<vmem>>, vector<128x64xf32>
    %cst = arith.constant dense<0.000000e+00> : vector<64x64xf32>
    %2 = tpu.matmul %0, %1, %cst {dimension_numbers = #tpu.dot_dimension_numbers<[1], [0], [0], [1], [0, 0, 1, 1], [], []>} : vector<64x128xf32>, vector<128x64xf32>, vector<64x64xf32> -> vector<64x64xf32>
    %c0_3 = arith.constant 0 : index
    %c0_4 = arith.constant 0 : index
    %3 = vector.load %arg3[%c0_3, %c0_4] : memref<1x64xf32, #tpu.memory_space<vmem>>, vector<1x64xf32>
    %4 = vector.broadcast %3 : vector<1x64xf32> to vector<64x64xf32>
    %5 = arith.addf %2, %4 : vector<64x64xf32>
    %6 = vector.shape_cast %5 : vector<64x64xf32> to vector<4x16x64xf32>
    %cst_5 = arith.constant dense<0.000000e+00> : vector<4x16xf32>
    %7 = vector.multi_reduction <add>, %6, %cst_5 [2] : vector<4x16x64xf32> to vector<4x16xf32>
    %8 = vector.shape_cast %7 : vector<4x16xf32> to vector<4x16x1xf32>
    %cst_6 = arith.constant dense<0.000000e+00> : vector<4x1xf32>
    %9 = vector.multi_reduction <add>, %8, %cst_6 [1] : vector<4x16x1xf32> to vector<4x1xf32>
    %10 = vector.shape_cast %9 : vector<4x1xf32> to vector<4x1x1xf32>
    %cst_7 = arith.constant 1.024000e+03 : f32
    %11 = vector.broadcast %cst_7 : f32 to vector<4x1x1xf32>
    %12 = arith.divf %10, %11 : vector<4x1x1xf32>
    %13 = vector.broadcast %12 : vector<4x1x1xf32> to vector<4x16x64xf32>
    %14 = arith.subf %6, %13 : vector<4x16x64xf32>
    %15 = arith.mulf %14, %14 : vector<4x16x64xf32>
    %cst_8 = arith.constant dense<0.000000e+00> : vector<4x16xf32>
    %16 = vector.multi_reduction <add>, %15, %cst_8 [2] : vector<4x16x64xf32> to vector<4x16xf32>
    %17 = vector.shape_cast %16 : vector<4x16xf32> to vector<4x16x1xf32>
    %cst_9 = arith.constant dense<0.000000e+00> : vector<4x1xf32>
    %18 = vector.multi_reduction <add>, %17, %cst_9 [1] : vector<4x16x1xf32> to vector<4x1xf32>
    %19 = vector.shape_cast %18 : vector<4x1xf32> to vector<4x1x1xf32>
    %cst_10 = arith.constant 1.024000e+03 : f32
    %20 = vector.broadcast %cst_10 : f32 to vector<4x1x1xf32>
    %21 = arith.divf %19, %20 : vector<4x1x1xf32>
    %cst_11 = arith.constant 9.99999974E-6 : f32
    %22 = vector.broadcast %cst_11 : f32 to vector<4x1x1xf32>
    %23 = arith.addf %21, %22 : vector<4x1x1xf32>
    %24 = math.rsqrt %23 : vector<4x1x1xf32>
    %25 = vector.broadcast %24 : vector<4x1x1xf32> to vector<4x16x64xf32>
    %26 = arith.mulf %14, %25 : vector<4x16x64xf32>
    %c0_12 = arith.constant 0 : index
    %c0_13 = arith.constant 0 : index
    %27 = vector.load %arg4[%c0_12, %c0_13] : memref<16x64xf32, #tpu.memory_space<vmem>>, vector<16x64xf32>
    %28 = vector.shape_cast %27 : vector<16x64xf32> to vector<1x16x64xf32>
    %29 = vector.broadcast %28 : vector<1x16x64xf32> to vector<4x16x64xf32>
    %30 = arith.mulf %26, %29 : vector<4x16x64xf32>
    %c0_14 = arith.constant 0 : index
    %c0_15 = arith.constant 0 : index
    %31 = vector.load %arg5[%c0_14, %c0_15] : memref<16x64xf32, #tpu.memory_space<vmem>>, vector<16x64xf32>
    %32 = vector.shape_cast %31 : vector<16x64xf32> to vector<1x16x64xf32>
    %33 = vector.broadcast %32 : vector<1x16x64xf32> to vector<4x16x64xf32>
    %34 = arith.addf %30, %33 : vector<4x16x64xf32>
    %cst_16 = arith.constant 0.000000e+00 : f32
    %35 = vector.broadcast %cst_16 : f32 to vector<4x16x64xf32>
    %36 = arith.maximumf %34, %35 : vector<4x16x64xf32>
    %37 = vector.shape_cast %36 : vector<4x16x64xf32> to vector<64x64xf32>
    %c0_17 = arith.constant 0 : index
    %c0_18 = arith.constant 0 : index
    %38 = vector.load %arg7[%c0_17, %c0_18] : memref<3x64xf32, #tpu.memory_space<vmem>>, vector<3x64xf32>
    %39 = vector.extract_strided_slice %38 {offsets = [0, 0], sizes = [1, 64], strides = [1, 1]} : vector<3x64xf32> to vector<1x64xf32>
    %40 = vector.broadcast %39 : vector<1x64xf32> to vector<64x64xf32>
    %41 = arith.mulf %37, %40 : vector<64x64xf32>
    %42 = vector.extract_strided_slice %38 {offsets = [1, 0], sizes = [1, 64], strides = [1, 1]} : vector<3x64xf32> to vector<1x64xf32>
    %43 = vector.broadcast %42 : vector<1x64xf32> to vector<64x64xf32>
    %44 = arith.mulf %37, %43 : vector<64x64xf32>
    %45 = vector.extract_strided_slice %38 {offsets = [2, 0], sizes = [1, 64], strides = [1, 1]} : vector<3x64xf32> to vector<1x64xf32>
    %46 = vector.broadcast %45 : vector<1x64xf32> to vector<64x64xf32>
    %47 = arith.mulf %37, %46 : vector<64x64xf32>
    %48 = tpu.concatenate %41, %44, %47 in 0 : vector<64x64xf32>, vector<64x64xf32>, vector<64x64xf32> -> vector<192x64xf32>
    %c0_19 = arith.constant 0 : index
    %c0_20 = arith.constant 0 : index
    %49 = vector.load %arg6[%c0_19, %c0_20] : memref<32x192xf32, #tpu.memory_space<vmem>>, vector<32x192xf32>
    %cst_21 = arith.constant dense<0.000000e+00> : vector<32x64xf32>
    %50 = tpu.matmul %49, %48, %cst_21 {dimension_numbers = #tpu.dot_dimension_numbers<[1], [0], [0], [1], [0, 0, 1, 1], [], []>} : vector<32x192xf32>, vector<192x64xf32>, vector<32x64xf32> -> vector<32x64xf32>
    %c0_22 = arith.constant 0 : index
    %c0_23 = arith.constant 0 : index
    %51 = vector.load %arg8[%c0_22, %c0_23] : memref<1x64xf32, #tpu.memory_space<vmem>>, vector<1x64xf32>
    %52 = vector.broadcast %51 : vector<1x64xf32> to vector<32x64xf32>
    %53 = arith.addf %50, %52 : vector<32x64xf32>
    %54 = vector.shape_cast %53 : vector<32x64xf32> to vector<4x8x64xf32>
    %cst_24 = arith.constant dense<0.000000e+00> : vector<4x8xf32>
    %55 = vector.multi_reduction <add>, %54, %cst_24 [2] : vector<4x8x64xf32> to vector<4x8xf32>
    %56 = vector.shape_cast %55 : vector<4x8xf32> to vector<4x8x1xf32>
    %cst_25 = arith.constant dense<0.000000e+00> : vector<4x1xf32>
    %57 = vector.multi_reduction <add>, %56, %cst_25 [1] : vector<4x8x1xf32> to vector<4x1xf32>
    %58 = vector.shape_cast %57 : vector<4x1xf32> to vector<4x1x1xf32>
    %cst_26 = arith.constant 5.120000e+02 : f32
    %59 = vector.broadcast %cst_26 : f32 to vector<4x1x1xf32>
    %60 = arith.divf %58, %59 : vector<4x1x1xf32>
    %61 = vector.broadcast %60 : vector<4x1x1xf32> to vector<4x8x64xf32>
    %62 = arith.subf %54, %61 : vector<4x8x64xf32>
    %63 = arith.mulf %62, %62 : vector<4x8x64xf32>
    %cst_27 = arith.constant dense<0.000000e+00> : vector<4x8xf32>
    %64 = vector.multi_reduction <add>, %63, %cst_27 [2] : vector<4x8x64xf32> to vector<4x8xf32>
    %65 = vector.shape_cast %64 : vector<4x8xf32> to vector<4x8x1xf32>
    %cst_28 = arith.constant dense<0.000000e+00> : vector<4x1xf32>
    %66 = vector.multi_reduction <add>, %65, %cst_28 [1] : vector<4x8x1xf32> to vector<4x1xf32>
    %67 = vector.shape_cast %66 : vector<4x1xf32> to vector<4x1x1xf32>
    %cst_29 = arith.constant 5.120000e+02 : f32
    %68 = vector.broadcast %cst_29 : f32 to vector<4x1x1xf32>
    %69 = arith.divf %67, %68 : vector<4x1x1xf32>
    %cst_30 = arith.constant 9.99999974E-6 : f32
    %70 = vector.broadcast %cst_30 : f32 to vector<4x1x1xf32>
    %71 = arith.addf %69, %70 : vector<4x1x1xf32>
    %72 = math.rsqrt %71 : vector<4x1x1xf32>
    %73 = vector.broadcast %72 : vector<4x1x1xf32> to vector<4x8x64xf32>
    %74 = arith.mulf %62, %73 : vector<4x8x64xf32>
    %c0_31 = arith.constant 0 : index
    %c0_32 = arith.constant 0 : index
    %75 = vector.load %arg9[%c0_31, %c0_32] : memref<8x64xf32, #tpu.memory_space<vmem>>, vector<8x64xf32>
    %76 = vector.shape_cast %75 : vector<8x64xf32> to vector<1x8x64xf32>
    %77 = vector.broadcast %76 : vector<1x8x64xf32> to vector<4x8x64xf32>
    %78 = arith.mulf %74, %77 : vector<4x8x64xf32>
    %c0_33 = arith.constant 0 : index
    %c0_34 = arith.constant 0 : index
    %79 = vector.load %arg10[%c0_33, %c0_34] : memref<8x64xf32, #tpu.memory_space<vmem>>, vector<8x64xf32>
    %80 = vector.shape_cast %79 : vector<8x64xf32> to vector<1x8x64xf32>
    %81 = vector.broadcast %80 : vector<1x8x64xf32> to vector<4x8x64xf32>
    %82 = arith.addf %78, %81 : vector<4x8x64xf32>
    %cst_35 = arith.constant 0.000000e+00 : f32
    %83 = vector.broadcast %cst_35 : f32 to vector<4x8x64xf32>
    %84 = arith.maximumf %82, %83 : vector<4x8x64xf32>
    %85 = vector.shape_cast %84 : vector<4x8x64xf32> to vector<32x64xf32>
    %c0_36 = arith.constant 0 : index
    %c0_37 = arith.constant 0 : index
    %86 = vector.load %arg11[%c0_36, %c0_37] : memref<32x64xf32, #tpu.memory_space<vmem>>, vector<32x64xf32>
    tpu.vector_store %arg11[%c0_36, %c0_37], %85 {strides = array<i32>} : memref<32x64xf32, #tpu.memory_space<vmem>>, vector<32x64xf32>,
    return
  }
  func.func @transform_0(%arg0: i32) -> (i32, i32) {
    %c0_i32 = arith.constant 0 : i32
    %c0_i32_0 = arith.constant 0 : i32
    return %arg0, %c0_i32 : i32, i32
  }
  func.func @transform_1(%arg0: i32) -> (i32, i32) {
    %c0_i32 = arith.constant 0 : i32
    %c0_i32_0 = arith.constant 0 : i32
    %c0_i32_1 = arith.constant 0 : i32
    return %c0_i32, %c0_i32_0 : i32, i32
  }
  func.func @transform_2(%arg0: i32) -> (i32, i32) {
    %c0_i32 = arith.constant 0 : i32
    %c0_i32_0 = arith.constant 0 : i32
    %c0_i32_1 = arith.constant 0 : i32
    return %c0_i32, %c0_i32_0 : i32, i32
  }
  func.func @transform_3(%arg0: i32) -> (i32, i32) {
    %c0_i32 = arith.constant 0 : i32
    %c0_i32_0 = arith.constant 0 : i32
    %c0_i32_1 = arith.constant 0 : i32
    return %c0_i32, %c0_i32_0 : i32, i32
  }
  func.func @transform_4(%arg0: i32) -> (i32, i32) {
    %c0_i32 = arith.constant 0 : i32
    %c0_i32_0 = arith.constant 0 : i32
    %c0_i32_1 = arith.constant 0 : i32
    return %c0_i32, %c0_i32_0 : i32, i32
  }
  func.func @transform_5(%arg0: i32) -> (i32, i32) {
    %c0_i32 = arith.constant 0 : i32
    %c0_i32_0 = arith.constant 0 : i32
    %c0_i32_1 = arith.constant 0 : i32
    return %c0_i32, %c0_i32_0 : i32, i32
  }
  func.func @transform_6(%arg0: i32) -> (i32, i32) {
    %c0_i32 = arith.constant 0 : i32
    %c0_i32_0 = arith.constant 0 : i32
    %c0_i32_1 = arith.constant 0 : i32
    return %c0_i32, %c0_i32_0 : i32, i32
  }
  func.func @transform_7(%arg0: i32) -> (i32, i32) {
    %c0_i32 = arith.constant 0 : i32
    %c0_i32_0 = arith.constant 0 : i32
    %c0_i32_1 = arith.constant 0 : i32
    return %c0_i32, %c0_i32_0 : i32, i32
  }
  func.func @transform_8(%arg0: i32) -> (i32, i32) {
    %c0_i32 = arith.constant 0 : i32
    %c0_i32_0 = arith.constant 0 : i32
    %c0_i32_1 = arith.constant 0 : i32
    return %c0_i32, %c0_i32_0 : i32, i32
  }
  func.func @transform_9(%arg0: i32) -> (i32, i32) {
    %c0_i32 = arith.constant 0 : i32
    %c0_i32_0 = arith.constant 0 : i32
    %c0_i32_1 = arith.constant 0 : i32
    return %c0_i32, %c0_i32_0 : i32, i32
  }
  func.func @transform_10(%arg0: i32) -> (i32, i32) {
    %c0_i32 = arith.constant 0 : i32
    %c0_i32_0 = arith.constant 0 : i32
    return %arg0, %c0_i32 : i32, i32
  }
}

</mosaic_0001>

<bundles_post_ra>
// kernel: sepconv_block.1
= control target key start
LH: loop header
LB: loop body
LE: loop exit
PB: predicated region body
PF: predicated region fallthrough
CT: control target
= control target key end

     0   :  { %s1103_s13 = smov 0   ;;  %s1425_s0 = inlined_call_operand.vmem [shape: f32[128,128], index: 0, kind: input, shape index: {}]   ;;  %s1426_s1 = inlined_call_operand.vmem [shape: f32[128,64], index: 1, kind: input, shape index: {}]   ;;  %s1427_s2 = inlined_call_operand.vmem [shape: f32[1,64], index: 2, kind: input, shape index: {}]   ;;  %s1428_s3 = inlined_call_operand.vmem [shape: f32[16,64], index: 3, kind: input, shape index: {}]   ;;  %s1429_s4 = inlined_call_operand.vmem [shape: f32[16,64], index: 4, kind: input, shape index: {}]   ;;  %s1430_s5 = inlined_call_operand.vmem [shape: f32[32,192], index: 5, kind: input, shape index: {}]   ;;  %s1431_s6 = inlined_call_operand.vmem [shape: f32[3,64], index: 6, kind: input, shape index: {}]   ;;  %s1432_s7 = inlined_call_operand.vmem [shape: f32[1,64], index: 7, kind: input, shape index: {}]   ;;  %s1433_s8 = inlined_call_operand.vmem [shape: f32[8,64], index: 8, kind: input, shape index: {}]   ;;  %s1434_s9 = inlined_call_operand.vmem [shape: f32[8,64], index: 9, kind: input, shape index: {}]   ;;  %s1435_s10 = inlined_call_operand.vmem [shape: f32[64,64], index: 10, kind: output, shape index: {}]  }
   0x1 LB: > { %s975_s14 = sadd.s32 4294967295, %s1044_s13   ;;  %p979_p0 = scmp.ge.s32.totalorder %s1044_s13, 1  ;;  %s1044_s13 = sphi %s1103_s13, %s20_s13  }
   0x2   : > { %p313_p1 = scmp.lt.s32.totalorder %s1044_s13, 3 }
   0x4   : > { %p314_p2 = pnand %p979_p0, %p313_p1 }
   0x5   : > { %s980_s11 = sshll.u32 (!%p314_p2), %s975_s14, 3  ;;  %s982_s28 = sshll.u32 (!%p314_p2), %s975_s14, 2 }
   0x6   : > { %317 = sbr.rel (%p314_p2) target bundleno = 985 (0x3d9), region = 60  ;;  %p352_p3 = scmp.lt.s32.totalorder (!%p314_p2), %s980_s11, 15 }
   0x7   : > { %p358_p4 = scmp.lt.s32.totalorder (!%p314_p2), %s982_s28, 7 }
   0xb   : > { %v386_v0 = vld [vmem:[%s1426_s1 + $0x78] sm:$0xff]  ;;  %v385_v1 = vld [vmem:[%s1426_s1 + $0x70] sm:$0xff]  ;;  %v384_v2 = vld [vmem:[%s1426_s1 + $0x68] sm:$0xff]  ;;  %s1437_s11 = smov (!%p352_p3, %s980_s11), 15  ;;  %vm432_vm0 = vcmask 523264   ;;  %v1046_v49 = vmov 1024.0  }
   0xc   : > { %391 = vmatpush.msra.mxu0 %v386_v0  ;;  %990 = vmatpush.msra.mxu3 %v386_v0  ;;  %v383_v3 = vld [vmem:[%s1426_s1 + $0x60] sm:$0xff]  ;;  %v382_v4 = vld [vmem:[%s1426_s1 + $0x58] sm:$0xff]  ;;  %v381_v5 = vld [vmem:[%s1426_s1 + $0x50] sm:$0xff]  ;;  %s981_s24 = sshll.u32 %s1437_s11, 3  ;;  %1018 = vrcp.f32 %v1046_v49  ;;  %s1439_s28 = smov (!%p358_p4, %s982_s28), 7 }
   0xd   : > { %v380_v6 = vld [vmem:[%s1426_s1 + $0x48] sm:$0xff]  ;;  %v379_v7 = vld [vmem:[%s1426_s1 + $0x40] sm:$0xff]  ;;  %v378_v8 = vld [vmem:[%s1426_s1 + $0x38] sm:$0xff]  ;;  %s355_s12 = scalar_lea.vmem %s1425_s0, %s981_s24  ;;  %s983_s15 = sshll.u32 %s1439_s28, 3 }
   0xe   : > { %392 = vmatpush.msra.mxu0 %v385_v1  ;;  %991 = vmatpush.msra.mxu3 %v385_v1  ;;  %v377_v9 = vld [vmem:[%s1426_s1 + $0x30] sm:$0xff]  ;;  %v376_v10 = vld [vmem:[%s1426_s1 + $0x28] sm:$0xff]  ;;  %v375_v11 = vld [vmem:[%s1426_s1 + $0x20] sm:$0xff]  ;;  %s1409_s17 = scalar_lea.vmem %s1435_s10, %s983_s15 }
   0xf   : > { %v374_v12 = vld [vmem:[%s1426_s1 + $0x18] sm:$0xff]  ;;  %v373_v13 = vld [vmem:[%s1426_s1 + $0x10] sm:$0xff]  ;;  %v372_v14 = vld [vmem:[%s1426_s1 + $0x8] sm:$0xff] }
  0x10   : > { %393 = vmatpush.msra.mxu0 %v384_v2  ;;  %992 = vmatpush.msra.mxu3 %v384_v2  ;;  %v371_v15 = vld [vmem:[%s1426_s1] sm:$0xff]  ;;  %v364_v18 = vld [vmem:[%s355_s12 + $0x8] sm:$0xff]  ;;  %v365_v20 = vld [vmem:[%s355_s12 + $0x10] sm:$0xff] }
  0x11   : > { %v363_v16 = vld [vmem:[%s355_s12] sm:$0xff]  ;;  %v368_v19 = vld [vmem:[%s355_s12 + $0x28] sm:$0xff]  ;;  %v369_v21 = vld [vmem:[%s355_s12 + $0x30] sm:$0xff] }
  0x12   : > { %394 = vmatpush.msra.mxu0 %v383_v3  ;;  %993 = vmatpush.msra.mxu3 %v383_v3  ;;  %v367_v17 = vld [vmem:[%s355_s12 + $0x20] sm:$0xff]  ;;  %v366_v22 = vld [vmem:[%s355_s12 + $0x18] sm:$0xff]  ;;  %v1019_v51 = vpop.eup %1018 }
  0x13   : > { %v370_v23 = vld [vmem:[%s355_s12 + $0x38] sm:$0xff]  ;;  %v1016_v25 = vld [vmem:[%s1427_s2] ss:$0 sm:$0xff]  ;;  %v486_v52 = vmul.f32 1024.0, %v1019_v51  ;;  %vm490_vm1 = vweird.f32 %v1019_v51 }
  0x14   : > { %395 = vmatpush.msra.mxu0 %v382_v4  ;;  %994 = vmatpush.msra.mxu3 %v382_v4 }
  0x15   : > { %v487_v54 = vsub.f32 1.0, %v486_v52 }
  0x16   : > { %396 = vmatpush.msra.mxu0 %v381_v5  ;;  %995 = vmatpush.msra.mxu3 %v381_v5 }
  0x17   : > { %v488_v58 = vmul.f32 %v1019_v51, %v487_v54 }
  0x18   : > { %397 = vmatpush.msra.mxu0 %v380_v6  ;;  %996 = vmatpush.msra.mxu3 %v380_v6 }
  0x19   : > { %v489_v62 = vadd.f32 %v1019_v51, %v488_v58 }
  0x1a   : > { %398 = vmatpush.msra.mxu0 %v379_v7  ;;  %997 = vmatpush.msra.mxu3 %v379_v7 }
  0x1b   : > { %v1190_v3 = vsel %vm490_vm1, %v1019_v51, %v489_v62 }
  0x1c   : > { %399 = vmatpush.msra.mxu0 %v378_v8  ;;  %998 = vmatpush.msra.mxu3 %v378_v8 }
  0x1e   : > { %400 = vmatpush.msra.mxu0 %v377_v9  ;;  %999 = vmatpush.msra.mxu3 %v377_v9 }
  0x20   : > { %401 = vmatpush.msra.mxu0 %v376_v10  ;;  %1000 = vmatpush.msra.mxu3 %v376_v10 }
  0x22   : > { %402 = vmatpush.msra.mxu0 %v375_v11  ;;  %1001 = vmatpush.msra.mxu3 %v375_v11 }
  0x24   : > { %403 = vmatpush.msra.mxu0 %v374_v12  ;;  %1002 = vmatpush.msra.mxu3 %v374_v12 }
  0x26   : > { %404 = vmatpush.msra.mxu0 %v373_v13  ;;  %1003 = vmatpush.msra.mxu3 %v373_v13 }
  0x28   : > { %405 = vmatpush.msra.mxu0 %v372_v14  ;;  %1004 = vmatpush.msra.mxu3 %v372_v14 }
  0x2a   : > { %406 = vmatpush.msra.mxu0 %v371_v15  ;;  %1005 = vmatpush.msra.mxu3 %v371_v15 }
  0x2b   : > { %407 = vmatmul.f32.vlgmr.msra.gmra.mxu0 %v363_v16  ;;  %419 = vmatmul.f32.vlgmr.msra.gmra.mxu3 %v367_v17 }
  0x33   : > { %410 = vmatmul.f32.gmra.mxu0 %v364_v18  ;;  %422 = vmatmul.f32.gmra.mxu3 %v368_v19 }
  0x3b   : > { %413 = vmatmul.f32.gmra.mxu0 %v365_v20  ;;  %425 = vmatmul.f32.gmra.mxu3 %v369_v21 }
  0x43   : > { %416 = vmatmul.f32.gmra.mxu0 %v366_v22  ;;  %428 = vmatmul.f32.gmra.mxu3 %v370_v23 }
  0xa8   : > { %v408_v24 = vpop.f32.mrf.mxu0 }
  0xa9   : > { %v1186_v47 = vadd.f32 %v1016_v25, %v408_v24 }
  0xab   : > { %v433_v48 = vsel %vm432_vm0, %v1186_v47, 0.0 }
  0xae   : > { %v420_v26 = vpop.f32.mrf.mxu3 }
  0xaf   : > { %v421_v27 = vadd.f32 %v1016_v25, %v420_v26 }
  0xb0   : > { %v411_v28 = vpop.f32.mrf.mxu0 }
  0xb1   : > { %v445_v29 = vsel %vm432_vm0, %v421_v27, 0.0  ;;  %v1174_v35 = vadd.f32 %v1016_v25, %v411_v28 }
  0xb2   : > { %446 = vadd.xlane.f32.xlu1 %v445_v29 }
  0xb3   : > { %v436_v39 = vsel %vm432_vm0, %v1174_v35, 0.0 }
  0xb6   : > { %v423_v30 = vpop.f32.mrf.mxu3 }
  0xb7   : > { %v1168_v31 = vadd.f32 %v1016_v25, %v423_v30 }
  0xb8   : > { %v414_v32 = vpop.f32.mrf.mxu0 }
  0xb9   : > { %v1170_v33 = vadd.f32 %v1016_v25, %v414_v32  ;;  %v448_v34 = vsel %vm432_vm0, %v1168_v31, 0.0 }
  0xba   : > { %449 = vadd.xlane.f32.xlu1 %v448_v34 }
  0xbb   : > { %v439_v36 = vsel %vm432_vm0, %v1170_v33, 0.0 }
  0xbc   : > { %440 = vadd.xlane.f32.xlu2 %v439_v36 }
  0xbe   : > { %v426_v37 = vpop.f32.mrf.mxu3 }
  0xbf   : > { %v1178_v38 = vadd.f32 %v1016_v25, %v426_v37 }
  0xc0   : > { %v417_v40 = vpop.f32.mrf.mxu0 }
  0xc1   : > { %v418_v41 = vadd.f32 %v1016_v25, %v417_v40  ;;  %v451_v42 = vsel %vm432_vm0, %v1178_v38, 0.0 }
  0xc2   : > { %452 = vadd.xlane.f32.xlu0 %v451_v42  ;;  %437 = vadd.xlane.f32.xlu1 %v436_v39 }
  0xc3   : > { %v442_v43 = vsel %vm432_vm0, %v418_v41, 0.0 }
  0xc4   : > { %443 = vadd.xlane.f32.xlu2 %v442_v43 }
  0xc6   : > { %v429_v44 = vpop.f32.mrf.mxu3 }
  0xc7   : > { %v430_v45 = vadd.f32 %v1016_v25, %v429_v44 }
  0xc9   : > { %v454_v46 = vsel %vm432_vm0, %v430_v45, 0.0 }
  0xca   : > { %455 = vadd.xlane.f32.xlu0 %v454_v46 }
  0xd2   : > { %434 = vadd.xlane.f32.xlu0 %v433_v48 }
 0x125   : > { %v447_v50 = vpop.xlane.xlu1 %446 }
 0x12d   : > { %v450_v53 = vpop.xlane.xlu1 %449 }
 0x12e   : > { %v471_v55 = vadd.f32 %v450_v53, %v447_v50 }
 0x12f   : > { %v441_v56 = vpop.xlane.xlu2 %440 }
 0x130   : > { %v472_v57 = vrot.slane %v471_v55, 4 }
 0x132   : > { %v473_v59 = vadd.f32 %v472_v57, %v471_v55 }
 0x134   : > { %v474_v60 = vrot.slane %v473_v59, 2 }
 0x135   : > { %v453_v61 = vpop.xlane.xlu0 %452  ;;  %v438_v20 = vpop.xlane.xlu1 %437 }
 0x136   : > { %v475_v63 = vadd.f32 %v474_v60, %v473_v59 }
 0x137   : > { %v444_v0 = vpop.xlane.xlu2 %443 }
 0x138   : > { %v476_v1 = vrot.slane %v475_v63, 1  ;;  %v464_v2 = vadd.f32 %v444_v0, %v441_v56 }
 0x13a   : > { %v477_v4 = vadd.f32 %v476_v1, %v475_v63  ;;  %v465_v5 = vrot.slane %v464_v2, 4 }
 0x13c   : > { %v466_v6 = vadd.f32 %v465_v5, %v464_v2  ;;  %v494_v7 = vmul.f32 %v1190_v3, %v477_v4 }
 0x13d   : > { %v456_v8 = vpop.xlane.xlu0 %455 }
 0x13e   : > { %v467_v9 = vrot.slane %v466_v6, 2  ;;  %v478_v10 = vadd.f32 %v456_v8, %v453_v61  ;;  %v1193_v11 = vsub.f32 %v421_v27, %v494_v7  ;;  %v1215_v44 = vsub.f32 %v1168_v31, %v494_v7 }
 0x140   : > { %v468_v12 = vadd.f32 %v467_v9, %v466_v6  ;;  %v479_v13 = vrot.slane %v478_v10, 4  ;;  %v508_v14 = vmul.f32 %v1193_v11, %v1193_v11 }
 0x142   : > { %v469_v15 = vrot.slane %v468_v12, 1  ;;  %v480_v16 = vadd.f32 %v479_v13, %v478_v10  ;;  %v524_v17 = vsel %vm432_vm0, %v508_v14, 0.0 }
 0x143   : > { %525 = vadd.xlane.f32.xlu1 %v524_v17 }
 0x144   : > { %v470_v18 = vadd.f32 %v469_v15, %v468_v12  ;;  %v481_v19 = vrot.slane %v480_v16, 2 }
 0x145   : > { %v435_v21 = vpop.xlane.xlu0 %434 }
 0x146   : > { %v482_v22 = vadd.f32 %v481_v19, %v480_v16  ;;  %v457_v23 = vadd.f32 %v438_v20, %v435_v21  ;;  %v493_v24 = vmul.f32 %v1190_v3, %v470_v18 }
 0x148   : > { %v483_v25 = vrot.slane %v482_v22, 1  ;;  %v458_v26 = vrot.slane %v457_v23, 4  ;;  %v1199_v27 = vsub.f32 %v418_v41, %v493_v24 }
 0x14a   : > { %v484_v28 = vadd.f32 %v483_v25, %v482_v22  ;;  %v459_v29 = vadd.f32 %v458_v26, %v457_v23  ;;  %v507_v30 = vmul.f32 %v1199_v27, %v1199_v27 }
 0x14c   : > { %v460_v32 = vrot.slane %v459_v29, 2  ;;  %v521_v34 = vsel %vm432_vm0, %v507_v30, 0.0  ;;  %v495_v36 = vmul.f32 %v1190_v3, %v484_v28 }
 0x14d   : > { %522 = vadd.xlane.f32.xlu1 %v521_v34 }
 0x14e   : > { %v461_v37 = vadd.f32 %v460_v32, %v459_v29  ;;  %v1206_v39 = vsub.f32 %v1178_v38, %v495_v36  ;;  %v1208_v40 = vsub.f32 %v430_v45, %v495_v36  ;;  %v1220_v38 = vsub.f32 %v1170_v33, %v493_v24 }
 0x14f   : > { %v509_v45 = vmul.f32 %v1215_v44, %v1215_v44 }
 0x150   : > { %v462_v42 = vrot.slane %v461_v37, 1  ;;  %v510_v41 = vmul.f32 %v1206_v39, %v1206_v39  ;;  %v511_v43 = vmul.f32 %v1208_v40, %v1208_v40  ;;  %v506_v50 = vmul.f32 %v1220_v38, %v1220_v38 }
 0x151   : > { %v527_v31 = vsel %vm432_vm0, %v509_v45, 0.0 }
 0x152   : > { %v463_v46 = vadd.f32 %v462_v42, %v461_v37  ;;  %v530_v48 = vsel %vm432_vm0, %v510_v41, 0.0  ;;  %v533_v49 = vsel %vm432_vm0, %v511_v43, 0.0  ;;  %v518_v52 = vsel %vm432_vm0, %v506_v50, 0.0 }
 0x153   : > { %531 = vadd.xlane.f32.xlu2 %v530_v48  ;;  %534 = vadd.xlane.f32.xlu0 %v533_v49 }
 0x154   : > { %v492_v51 = vmul.f32 %v1190_v3, %v463_v46 }
 0x156   : > { %v1230_v53 = vsub.f32 %v1174_v35, %v492_v51  ;;  %v1233_v33 = vsub.f32 %v1186_v47, %v492_v51 }
 0x158   : > { %v505_v54 = vmul.f32 %v1230_v53, %v1230_v53  ;;  %v504_v55 = vmul.f32 %v1233_v33, %v1233_v33 }
 0x15a   : > { %v515_v56 = vsel %vm432_vm0, %v505_v54, 0.0  ;;  %v512_v57 = vsel %vm432_vm0, %v504_v55, 0.0 }
 0x15b   : > { %528 = vadd.xlane.f32.xlu2 %v527_v31  ;;  %519 = vadd.xlane.f32.xlu0 %v518_v52 }
 0x163   : > { %516 = vadd.xlane.f32.xlu0 %v515_v56  ;;  %513 = vadd.xlane.f32.xlu2 %v512_v57 }
 0x1b6   : > { %v526_v58 = vpop.xlane.xlu1 %525 }
 0x1c0   : > { %v523_v62 = vpop.xlane.xlu1 %522 }
 0x1c6   : > { %v532_v35 = vpop.xlane.xlu2 %531  ;;  %v535_v59 = vpop.xlane.xlu0 %534 }
 0x1c7   : > { %v557_v60 = vadd.f32 %v535_v59, %v532_v35  ;;  %v1251_v35 = vld [vmem:[%s1428_s3 + $0x8] sm:$0xff] }
 0x1c9   : > { %v558_v47 = vrot.slane %v557_v60, 4 }
 0x1cb   : > { %v559_v61 = vadd.f32 %v558_v47, %v557_v60  ;;  %v1262_v47 = vld [vmem:[%s1431_s6] sm:$0x7] }
 0x1cd   : > { %v560_v63 = vrot.slane %v559_v61, 2 }
 0x1ce   : > { %v529_v0 = vpop.xlane.xlu2 %528  ;;  %v520_v1 = vpop.xlane.xlu0 %519 }
 0x1cf   : > { %v561_v2 = vadd.f32 %v560_v63, %v559_v61  ;;  %v550_v4 = vadd.f32 %v529_v0, %v526_v58  ;;  %v543_v5 = vadd.f32 %v523_v62, %v520_v1  ;;  %v1268_v63 = vld [vmem:[%s1429_s4 + $0x8] sm:$0xff]  ;;  %v1273_v0 = vld [vmem:[%s1429_s4] sm:$0xff] }
 0x1d1   : > { %v562_v6 = vrot.slane %v561_v2, 1  ;;  %v551_v7 = vrot.slane %v550_v4, 4  ;;  %v544_v8 = vrot.slane %v543_v5, 4 }
 0x1d3   : > { %v563_v9 = vadd.f32 %v562_v6, %v561_v2  ;;  %v552_v10 = vadd.f32 %v551_v7, %v550_v4  ;;  %v545_v12 = vadd.f32 %v544_v8, %v543_v5  ;;  %v1278_v5 = vperm.slane %v1262_v47, 1 }
 0x1d4   : > { %v1282_v8 = vperm.slane %v1262_v47, 2 }
 0x1d5   : > { %v567_v13 = vmul.f32 %v563_v9, %v1190_v3  ;;  %v553_v14 = vrot.slane %v552_v10, 2  ;;  %v546_v15 = vrot.slane %v545_v12, 2 }
 0x1d6   : > { %v514_v16 = vpop.xlane.xlu2 %513  ;;  %v517_v17 = vpop.xlane.xlu0 %516 }
 0x1d7   : > { %v571_v18 = vadd.f32 1e-05, %v567_v13  ;;  %v554_v19 = vadd.f32 %v553_v14, %v552_v10  ;;  %v547_v20 = vadd.f32 %v546_v15, %v545_v12  ;;  %v536_v21 = vadd.f32 %v517_v17, %v514_v16 }
 0x1d9   : > { %1020 = vrsqrt.f32 %v571_v18  ;;  %v555_v22 = vrot.slane %v554_v19, 1  ;;  %v548_v23 = vrot.slane %v547_v20, 1  ;;  %v537_v24 = vrot.slane %v536_v21, 4 }
 0x1da   : > { %vm608_vm3 = vweird.f32 %v571_v18 }
 0x1db   : > { %v556_v25 = vadd.f32 %v555_v22, %v554_v19  ;;  %v549_v26 = vadd.f32 %v548_v23, %v547_v20  ;;  %v538_v28 = vadd.f32 %v537_v24, %v536_v21 }
 0x1dd   : > { %v566_v29 = vmul.f32 %v556_v25, %v1190_v3  ;;  %v565_v30 = vmul.f32 %v549_v26, %v1190_v3  ;;  %v539_v32 = vrot.slane %v538_v28, 2 }
 0x1df   : > { %v1021_v34 = vpop.eup %1020  ;;  %v570_v36 = vadd.f32 1e-05, %v566_v29  ;;  %v569_v37 = vadd.f32 1e-05, %v565_v30  ;;  %v540_v42 = vadd.f32 %v539_v32, %v538_v28 }
 0x1e0   : > { %v603_v41 = vmul.f32 %v1021_v34, %v571_v18  ;;  %vm609_vm2 = vweird.f32 %v1021_v34 }
 0x1e1   : > { %1022 = vrsqrt.f32 %v570_v36  ;;  %v541_v43 = vrot.slane %v540_v42, 1  ;;  %vm610_vm4 = vmor %vm608_vm3, %vm609_vm2  ;;  %vm598_vm6 = vweird.f32 %v570_v36  ;;  %vm588_vm9 = vweird.f32 %v569_v37 }
 0x1e2   : > { %v604_v46 = vmul.f32 %v1021_v34, %v603_v41  ;;  %1024 = vrsqrt.f32 %v569_v37 }
 0x1e3   : > { %v542_v48 = vadd.f32 %v541_v43, %v540_v42 }
 0x1e4   : > { %v605_v49 = vmul.f32 0.5, %v604_v46 }
 0x1e5   : > { %v564_v45 = vmul.f32 %v542_v48, %v1190_v3  ;;  %v1256_v3 = vld [vmem:[%s1428_s3] sm:$0xff] }
 0x1e6   : > { %v606_v50 = vsub.f32 1.5, %v605_v49 }
 0x1e7   : > { %v1023_v51 = vpop.eup %1022  ;;  %v1245_v31 = vadd.f32 1e-05, %v564_v45 }
 0x1e8   : > { %v1025_v52 = vpop.eup %1024  ;;  %v593_v54 = vmul.f32 %v1023_v51, %v570_v36  ;;  %v607_v55 = vmul.f32 %v1021_v34, %v606_v50  ;;  %vm599_vm5 = vweird.f32 %v1023_v51 }
 0x1e9   : > { %v583_v56 = vmul.f32 %v1025_v52, %v569_v37  ;;  %1026 = vrsqrt.f32 %v1245_v31  ;;  %vm589_vm7 = vweird.f32 %v1025_v52  ;;  %vm600_vm8 = vmor %vm598_vm6, %vm599_vm5  ;;  %vm578_vm12 = vweird.f32 %v1245_v31 }
 0x1ea   : > { %v594_v57 = vmul.f32 %v1023_v51, %v593_v54  ;;  %v611_v58 = vsel %vm610_vm4, %v1021_v34, %v607_v55  ;;  %vm590_vm10 = vmor %vm588_vm9, %vm589_vm7 }
 0x1eb   : > { %v584_v59 = vmul.f32 %v1025_v52, %v583_v56  ;;  %v619_v60 = vmul.f32 %v611_v58, %v1208_v40  ;;  %v618_v61 = vmul.f32 %v611_v58, %v1206_v39 }
 0x1ec   : > { %v595_v62 = vmul.f32 0.5, %v594_v57 }
 0x1ed   : > { %v585_v1 = vmul.f32 0.5, %v584_v59  ;;  %v629_v40 = vmul.f32 %v1251_v35, %v619_v60  ;;  %v628_v2 = vmul.f32 %v1256_v3, %v618_v61 }
 0x1ee   : > { %v596_v4 = vsub.f32 1.5, %v595_v62  ;;  %v649_v62 = vperm.slane %v1262_v47, 0 }
 0x1ef   : > { %v1027_v39 = vpop.eup %1026  ;;  %v586_v6 = vsub.f32 1.5, %v585_v1  ;;  %v639_v7 = vadd.f32 %v1268_v63, %v629_v40  ;;  %v638_v9 = vadd.f32 %v1273_v0, %v628_v2  ;;  %v677_v1 = vld [vmem:[%s1430_s5 + $0x8] sm:$0xff] }
 0x1f0   : > { %v573_v10 = vmul.f32 %v1027_v39, %v1245_v31  ;;  %v597_v12 = vmul.f32 %v1023_v51, %v596_v4  ;;  %vm579_vm11 = vweird.f32 %v1027_v39 }
 0x1f1   : > { %v1286_v13 = vmax.f32 %v639_v7, 0.0  ;;  %v1288_v14 = vmax.f32 %v638_v9, 0.0  ;;  %v587_v15 = vmul.f32 %v1025_v52, %v586_v6  ;;  %vm580_vm13 = vmor %vm578_vm12, %vm579_vm11  ;;  %v676_v9 = vld [vmem:[%s1430_s5] sm:$0xff] }
 0x1f2   : > { %v574_v16 = vmul.f32 %v1027_v39, %v573_v10  ;;  %v601_v17 = vsel %vm600_vm8, %v1023_v51, %v597_v12  ;;  %v681_v10 = vld [vmem:[%s1430_s5 + $0x28] sm:$0xff]  ;;  %v678_v12 = vld [vmem:[%s1430_s5 + $0x10] sm:$0xff] }
 0x1f3   : > { %v666_v18 = vmul.f32 %v1278_v5, %v1286_v13  ;;  %v675_v19 = vmul.f32 %v1282_v8, %v1286_v13  ;;  %v665_v20 = vmul.f32 %v1278_v5, %v1288_v14  ;;  %v617_v22 = vmul.f32 %v601_v17, %v1215_v44 }
 0x1f4   : > { %v575_v21 = vmul.f32 0.5, %v574_v16  ;;  %v616_v23 = vmul.f32 %v601_v17, %v1193_v11  ;;  %v591_v24 = vsel %vm590_vm10, %v1025_v52, %v587_v15  ;;  %v674_v25 = vmul.f32 %v1282_v8, %v1288_v14  ;;  %v682_v15 = vld [vmem:[%s1430_s5 + $0x30] sm:$0xff]  ;;  %v1017_v17 = vld [vmem:[%s1432_s7] ss:$0 sm:$0xff] }
 0x1f5   : > { %700 = vmatpush.msra.mxu1 %v666_v18  ;;  %737 = vmatpush.msra.mxu2 %v675_v19  ;;  %v615_v26 = vmul.f32 %v591_v24, %v1199_v27  ;;  %v614_v28 = vmul.f32 %v591_v24, %v1220_v38  ;;  %v627_v30 = vmul.f32 %v1251_v35, %v617_v22 }
 0x1f6   : > { %v576_v29 = vsub.f32 1.5, %v575_v21  ;;  %v626_v32 = vmul.f32 %v1256_v3, %v616_v23  ;;  %v657_v40 = vmul.f32 %v649_v62, %v1286_v13  ;;  %v656_v2 = vmul.f32 %v649_v62, %v1288_v14  ;;  %v683_v13 = vld [vmem:[%s1430_s5 + $0x38] sm:$0xff]  ;;  %v680_v14 = vld [vmem:[%s1430_s5 + $0x20] sm:$0xff] }
 0x1f7   : > { %701 = vmatpush.msra.mxu1 %v665_v20  ;;  %738 = vmatpush.msra.mxu2 %v674_v25  ;;  %v625_v11 = vmul.f32 %v1251_v35, %v615_v26  ;;  %v624_v44 = vmul.f32 %v1256_v3, %v614_v28  ;;  %v637_v34 = vadd.f32 %v1268_v63, %v627_v30 }
 0x1f8   : > { %v636_v27 = vadd.f32 %v1273_v0, %v626_v32  ;;  %v577_v36 = vmul.f32 %v1027_v39, %v576_v29 }
 0x1f9   : > { %v635_v38 = vadd.f32 %v1268_v63, %v625_v11  ;;  %v645_v37 = vmax.f32 %v637_v34, 0.0  ;;  %v634_v41 = vadd.f32 %v1273_v0, %v624_v44 }
 0x1fa   : > { %v644_v42 = vmax.f32 %v636_v27, 0.0  ;;  %v581_v43 = vsel %vm580_vm13, %v1027_v39, %v577_v36 }
 0x1fb   : > { %v643_v46 = vmax.f32 %v635_v38, 0.0  ;;  %v613_v48 = vmul.f32 %v581_v43, %v1230_v53  ;;  %v612_v49 = vmul.f32 %v581_v43, %v1233_v33  ;;  %v664_v45 = vmul.f32 %v1278_v5, %v645_v37 }
 0x1fc   : > { %v673_v50 = vmul.f32 %v1282_v8, %v645_v37  ;;  %v663_v51 = vmul.f32 %v1278_v5, %v644_v42  ;;  %v672_v31 = vmul.f32 %v1282_v8, %v644_v42  ;;  %v642_v52 = vmax.f32 %v634_v41, 0.0 }
 0x1fd   : > { %702 = vmatpush.msra.mxu1 %v664_v45  ;;  %v623_v54 = vmul.f32 %v1251_v35, %v613_v48  ;;  %v622_v55 = vmul.f32 %v1256_v3, %v612_v49  ;;  %v662_v56 = vmul.f32 %v1278_v5, %v643_v46  ;;  %v671_v53 = vmul.f32 %v1282_v8, %v643_v46 }
 0x1fe   : > { %739 = vmatpush.msra.mxu2 %v673_v50  ;;  %v661_v58 = vmul.f32 %v1278_v5, %v642_v52  ;;  %v670_v59 = vmul.f32 %v1282_v8, %v642_v52  ;;  %v655_v47 = vmul.f32 %v649_v62, %v645_v37  ;;  %v654_v4 = vmul.f32 %v649_v62, %v644_v42 }
 0x1ff   : > { %703 = vmatpush.msra.mxu1 %v663_v51  ;;  %v633_v33 = vadd.f32 %v1268_v63, %v623_v54  ;;  %v632_v57 = vadd.f32 %v1273_v0, %v622_v55  ;;  %v653_v39 = vmul.f32 %v649_v62, %v643_v46  ;;  %v652_v6 = vmul.f32 %v649_v62, %v642_v52 }
 0x200   : > { %740 = vmatpush.msra.mxu2 %v672_v31  ;;  %v1047_v37 = vmov 512.0  }
 0x201   : > { %704 = vmatpush.msra.mxu1 %v662_v56  ;;  %v641_v60 = vmax.f32 %v633_v33, 0.0  ;;  %v640_v35 = vmax.f32 %v632_v57, 0.0  ;;  %1028 = vrcp.f32 %v1047_v37 }
 0x202   : > { %741 = vmatpush.msra.mxu2 %v671_v53 }
 0x203   : > { %705 = vmatpush.msra.mxu1 %v661_v58  ;;  %v660_v3 = vmul.f32 %v1278_v5, %v641_v60  ;;  %v669_v61 = vmul.f32 %v1282_v8, %v641_v60  ;;  %v659_v63 = vmul.f32 %v1278_v5, %v640_v35  ;;  %v668_v0 = vmul.f32 %v1282_v8, %v640_v35  ;;  %v679_v5 = vld [vmem:[%s1430_s5 + $0x18] sm:$0xff] }
 0x204   : > { %742 = vmatpush.msra.mxu2 %v670_v59  ;;  %v651_v7 = vmul.f32 %v649_v62, %v641_v60  ;;  %v650_v8 = vmul.f32 %v649_v62, %v640_v35 }
 0x205   : > { %706 = vmatpush.msra.mxu1 %v660_v3 }
 0x206   : > { %743 = vmatpush.msra.mxu2 %v669_v61 }
 0x207   : > { %707 = vmatpush.msra.mxu1 %v659_v63  ;;  %v1029_v42 = vpop.eup %1028 }
 0x208   : > { %744 = vmatpush.msra.mxu2 %v668_v0  ;;  %v795_v41 = vmul.f32 512.0, %v1029_v42  ;;  %vm799_vm14 = vweird.f32 %v1029_v42 }
 0x209   : > { %984 = vmatmul.msk.f32.vlgmr.msra.gmra.mxu2 %vm432_vm0, %v677_v1  ;;  %708 = vmatpush.msra.mxu1 %v657_v40 }
 0x20a   : > { %v796_v43 = vsub.f32 1.0, %v795_v41 }
 0x20b   : > { %709 = vmatpush.msra.mxu1 %v656_v2 }
 0x20c   : > { %v797_v49 = vmul.f32 %v1029_v42, %v796_v43 }
 0x20d   : > { %710 = vmatpush.msra.mxu1 %v655_v47 }
 0x20e   : > { %v798_v51 = vadd.f32 %v1029_v42, %v797_v49 }
 0x20f   : > { %711 = vmatpush.msra.mxu1 %v654_v4 }
 0x210   : > { %v1367_v56 = vsel %vm799_vm14, %v1029_v42, %v798_v51 }
 0x211   : > { %985 = vmatmul.msk.f32.gmra.mxu2 %vm432_vm0, %v679_v5  ;;  %712 = vmatpush.msra.mxu1 %v653_v39 }
 0x213   : > { %713 = vmatpush.msra.mxu1 %v652_v6 }
 0x215   : > { %714 = vmatpush.msra.mxu1 %v651_v7 }
 0x217   : > { %715 = vmatpush.msra.mxu1 %v650_v8 }
 0x218   : > { %716 = vmatmul.f32.vlgmr.msra.gmra.mxu1 %v676_v9 }
 0x219   : > { %986 = vmatmul.msk.f32.gmra.mxu2 %vm432_vm0, %v681_v10 }
 0x220   : > { %719 = vmatmul.f32.gmra.mxu1 %v678_v12 }
 0x221   : > { %987 = vmatmul.msk.f32.gmra.mxu2 %vm432_vm0, %v683_v13 }
 0x228   : > { %722 = vmatmul.f32.gmra.mxu1 %v680_v14 }
 0x230   : > { %725 = vmatmul.f32.gmra.mxu1 %v682_v15 }
 0x28c   : > { %v746_v16 = vpop.f32.mrf.mxu2 }
 0x294   : > { %v749_v21 = vpop.f32.mrf.mxu2 }
 0x295   : > { %v717_v18 = vpop.f32.mrf.mxu1 }
 0x296   : > { %v718_v19 = vadd.f32 %v1017_v17, %v717_v18 }
 0x298   : > { %v747_v20 = vadd.f32 %v746_v16, %v718_v19 }
 0x29a   : > { %v758_v22 = vsel %vm432_vm0, %v747_v20, 0.0 }
 0x29b   : > { %759 = vadd.xlane.f32.xlu1 %v758_v22 }
 0x29c   : > { %v752_v28 = vpop.f32.mrf.mxu2 }
 0x29d   : > { %v720_v23 = vpop.f32.mrf.mxu1 }
 0x29e   : > { %v721_v24 = vadd.f32 %v1017_v17, %v720_v23 }
 0x2a0   : > { %v750_v25 = vadd.f32 %v749_v21, %v721_v24 }
 0x2a2   : > { %v761_v26 = vsel %vm432_vm0, %v750_v25, 0.0 }
 0x2a3   : > { %762 = vadd.xlane.f32.xlu2 %v761_v26 }
 0x2a4   : > { %v755_v34 = vpop.f32.mrf.mxu2 }
 0x2a5   : > { %v723_v29 = vpop.f32.mrf.mxu1 }
 0x2a6   : > { %v724_v30 = vadd.f32 %v1017_v17, %v723_v29 }
 0x2a8   : > { %v753_v32 = vadd.f32 %v752_v28, %v724_v30 }
 0x2aa   : > { %v764_v11 = vsel %vm432_vm0, %v753_v32, 0.0 }
 0x2ab   : > { %765 = vadd.xlane.f32.xlu0 %v764_v11 }
 0x2ad   : > { %v726_v44 = vpop.f32.mrf.mxu1 }
 0x2ae   : > { %v727_v27 = vadd.f32 %v1017_v17, %v726_v44 }
 0x2b0   : > { %v756_v36 = vadd.f32 %v755_v34, %v727_v27 }
 0x2b2   : > { %v767_v38 = vsel %vm432_vm0, %v756_v36, 0.0 }
 0x2b3   : > { %768 = vadd.xlane.f32.xlu1 %v767_v38 }
 0x30e   : > { %v760_v46 = vpop.xlane.xlu1 %759 }
 0x30f   : > { %v770_v48 = vrot.slane %v760_v46, 4 }
 0x311   : > { %v771_v45 = vadd.f32 %v770_v48, %v760_v46 }
 0x313   : > { %v772_v50 = vrot.slane %v771_v45, 2 }
 0x315   : > { %v773_v31 = vadd.f32 %v772_v50, %v771_v45 }
 0x316   : > { %v763_v52 = vpop.xlane.xlu2 %762 }
 0x317   : > { %v774_v54 = vrot.slane %v773_v31, 1  ;;  %v776_v55 = vrot.slane %v763_v52, 4 }
 0x319   : > { %v775_v53 = vadd.f32 %v774_v54, %v773_v31  ;;  %v777_v33 = vadd.f32 %v776_v55, %v763_v52 }
 0x31b   : > { %v778_v57 = vrot.slane %v777_v33, 2  ;;  %v801_v58 = vmul.f32 %v1367_v56, %v775_v53 }
 0x31d   : > { %v779_v59 = vadd.f32 %v778_v57, %v777_v33  ;;  %v1370_v60 = vsub.f32 %v747_v20, %v801_v58 }
 0x31e   : > { %v766_v35 = vpop.xlane.xlu0 %765 }
 0x31f   : > { %v780_v3 = vrot.slane %v779_v59, 1  ;;  %v782_v61 = vrot.slane %v766_v35, 4  ;;  %v809_v62 = vmul.f32 %v1370_v60, %v1370_v60 }
 0x321   : > { %v781_v63 = vadd.f32 %v780_v3, %v779_v59  ;;  %v783_v0 = vadd.f32 %v782_v61, %v766_v35  ;;  %v813_v1 = vsel %vm432_vm0, %v809_v62, 0.0 }
 0x322   : > { %814 = vadd.xlane.f32.xlu2 %v813_v1 }
 0x323   : > { %v784_v40 = vrot.slane %v783_v0, 2  ;;  %v802_v2 = vmul.f32 %v1367_v56, %v781_v63 }
 0x325   : > { %v785_v47 = vadd.f32 %v784_v40, %v783_v0  ;;  %v1376_v4 = vsub.f32 %v750_v25, %v802_v2 }
 0x326   : > { %v769_v5 = vpop.xlane.xlu1 %768 }
 0x327   : > { %v786_v39 = vrot.slane %v785_v47, 1  ;;  %v788_v6 = vrot.slane %v769_v5, 4  ;;  %v810_v7 = vmul.f32 %v1376_v4, %v1376_v4 }
 0x329   : > { %v787_v8 = vadd.f32 %v786_v39, %v785_v47  ;;  %v789_v9 = vadd.f32 %v788_v6, %v769_v5  ;;  %v816_v10 = vsel %vm432_vm0, %v810_v7, 0.0  ;;  %v901_v47 = vld [vmem:[%s1433_s8] sm:$0xff] }
 0x32a   : > { %817 = vadd.xlane.f32.xlu0 %v816_v10 }
 0x32b   : > { %v790_v12 = vrot.slane %v789_v9, 2  ;;  %v803_v13 = vmul.f32 %v1367_v56, %v787_v8  ;;  %v906_v8 = vld [vmem:[%s1434_s9] sm:$0xff] }
 0x32d   : > { %v791_v14 = vadd.f32 %v790_v12, %v789_v9  ;;  %v1382_v15 = vsub.f32 %v753_v32, %v803_v13 }
 0x32f   : > { %v792_v16 = vrot.slane %v791_v14, 1  ;;  %v811_v17 = vmul.f32 %v1382_v15, %v1382_v15 }
 0x331   : > { %v793_v18 = vadd.f32 %v792_v16, %v791_v14  ;;  %v819_v19 = vsel %vm432_vm0, %v811_v17, 0.0 }
 0x332   : > { %820 = vadd.xlane.f32.xlu1 %v819_v19 }
 0x333   : > { %v804_v20 = vmul.f32 %v1367_v56, %v793_v18 }
 0x335   : > { %v1388_v21 = vsub.f32 %v756_v36, %v804_v20 }
 0x337   : > { %v812_v22 = vmul.f32 %v1388_v21, %v1388_v21 }
 0x339   : > { %v822_v23 = vsel %vm432_vm0, %v812_v22, 0.0 }
 0x33a   : > { %823 = vadd.xlane.f32.xlu2 %v822_v23 }
 0x395   : > { %v815_v24 = vpop.xlane.xlu2 %814 }
 0x396   : > { %v825_v25 = vrot.slane %v815_v24, 4 }
 0x398   : > { %v826_v26 = vadd.f32 %v825_v25, %v815_v24 }
 0x39a   : > { %v827_v28 = vrot.slane %v826_v26, 2 }
 0x39c   : > { %v828_v29 = vadd.f32 %v827_v28, %v826_v26 }
 0x39d   : > { %v818_v30 = vpop.xlane.xlu0 %817 }
 0x39e   : > { %v829_v32 = vrot.slane %v828_v29, 1  ;;  %v831_v11 = vrot.slane %v818_v30, 4 }
 0x3a0   : > { %v830_v44 = vadd.f32 %v829_v32, %v828_v29  ;;  %v832_v34 = vadd.f32 %v831_v11, %v818_v30 }
 0x3a2   : > { %v849_v27 = vmul.f32 %v830_v44, %v1367_v56  ;;  %v833_v36 = vrot.slane %v832_v34, 2 }
 0x3a4   : > { %v853_v38 = vadd.f32 1e-05, %v849_v27  ;;  %v834_v37 = vadd.f32 %v833_v36, %v832_v34 }
 0x3a5   : > { %v821_v42 = vpop.xlane.xlu1 %820 }
 0x3a6   : > { %1030 = vrsqrt.f32 %v853_v38  ;;  %v835_v41 = vrot.slane %v834_v37, 1  ;;  %v837_v43 = vrot.slane %v821_v42, 4  ;;  %vm863_vm1 = vweird.f32 %v853_v38 }
 0x3a8   : > { %v836_v46 = vadd.f32 %v835_v41, %v834_v37  ;;  %v838_v48 = vadd.f32 %v837_v43, %v821_v42 }
 0x3aa   : > { %v850_v49 = vmul.f32 %v836_v46, %v1367_v56  ;;  %v839_v45 = vrot.slane %v838_v48, 2 }
 0x3ac   : > { %v1031_v50 = vpop.eup %1030  ;;  %v854_v51 = vadd.f32 1e-05, %v850_v49  ;;  %v840_v31 = vadd.f32 %v839_v45, %v838_v48 }
 0x3ad   : > { %v858_v52 = vmul.f32 %v1031_v50, %v853_v38  ;;  %v824_v54 = vpop.xlane.xlu2 %823  ;;  %vm864_vm15 = vweird.f32 %v1031_v50 }
 0x3ae   : > { %1032 = vrsqrt.f32 %v854_v51  ;;  %v841_v55 = vrot.slane %v840_v31, 1  ;;  %v843_v53 = vrot.slane %v824_v54, 4  ;;  %vm865_vm2 = vmor %vm863_vm1, %vm864_vm15  ;;  %vm873_vm4 = vweird.f32 %v854_v51 }
 0x3af   : > { %v859_v33 = vmul.f32 %v1031_v50, %v858_v52 }
 0x3b0   : > { %v842_v57 = vadd.f32 %v841_v55, %v840_v31  ;;  %v844_v58 = vadd.f32 %v843_v53, %v824_v54 }
 0x3b1   : > { %v860_v59 = vmul.f32 0.5, %v859_v33 }
 0x3b2   : > { %v851_v35 = vmul.f32 %v842_v57, %v1367_v56  ;;  %v845_v3 = vrot.slane %v844_v58, 2 }
 0x3b3   : > { %v861_v61 = vsub.f32 1.5, %v860_v59 }
 0x3b4   : > { %v1033_v62 = vpop.eup %1032  ;;  %v855_v63 = vadd.f32 1e-05, %v851_v35  ;;  %v846_v0 = vadd.f32 %v845_v3, %v844_v58 }
 0x3b5   : > { %v862_v1 = vmul.f32 %v1031_v50, %v861_v61  ;;  %v868_v40 = vmul.f32 %v1033_v62, %v854_v51  ;;  %vm874_vm3 = vweird.f32 %v1033_v62 }
 0x3b6   : > { %1034 = vrsqrt.f32 %v855_v63  ;;  %v847_v2 = vrot.slane %v846_v0, 1  ;;  %vm875_vm5 = vmor %vm873_vm4, %vm874_vm3  ;;  %vm883_vm7 = vweird.f32 %v855_v63 }
 0x3b7   : > { %v866_v5 = vsel %vm865_vm2, %v1031_v50, %v862_v1  ;;  %v869_v39 = vmul.f32 %v1033_v62, %v868_v40 }
 0x3b8   : > { %v897_v6 = vmul.f32 %v866_v5, %v1370_v60  ;;  %v848_v7 = vadd.f32 %v847_v2, %v846_v0 }
 0x3b9   : > { %v870_v9 = vmul.f32 0.5, %v869_v39 }
 0x3ba   : > { %v902_v10 = vmul.f32 %v901_v47, %v897_v6  ;;  %v852_v12 = vmul.f32 %v848_v7, %v1367_v56 }
 0x3bb   : > { %v871_v13 = vsub.f32 1.5, %v870_v9 }
 0x3bc   : > { %v1035_v14 = vpop.eup %1034  ;;  %v907_v16 = vadd.f32 %v906_v8, %v902_v10  ;;  %v856_v17 = vadd.f32 1e-05, %v852_v12 }
 0x3bd   : > { %v872_v60 = vmul.f32 %v1033_v62, %v871_v13  ;;  %v878_v18 = vmul.f32 %v1035_v14, %v855_v63  ;;  %vm884_vm6 = vweird.f32 %v1035_v14 }
 0x3be   : > { %v911_v19 = vmax.f32 %v907_v16, 0.0  ;;  %1036 = vrsqrt.f32 %v856_v17  ;;  %vm885_vm8 = vmor %vm883_vm7, %vm884_vm6  ;;  %vm893_vm10 = vweird.f32 %v856_v17 }
 0x3bf   : > { %v876_v20 = vsel %vm875_vm5, %v1033_v62, %v872_v60  ;;  %v879_v22 = vmul.f32 %v1035_v14, %v878_v18 }
 0x3c0   : > { %915 = vst.msk [vmem:[%s1409_s17] sm:$0xff] %vm432_vm0, %v911_v19  ;;  %v898_v56 = vmul.f32 %v876_v20, %v1376_v4 }
 0x3c1   : > { %v880_v23 = vmul.f32 0.5, %v879_v22 }
 0x3c2   : > { %v903_v24 = vmul.f32 %v901_v47, %v898_v56 }
 0x3c3   : > { %v881_v25 = vsub.f32 1.5, %v880_v23 }
 0x3c4   : > { %v1037_v26 = vpop.eup %1036  ;;  %v908_v28 = vadd.f32 %v906_v8, %v903_v24 }
 0x3c5   : > { %v882_v29 = vmul.f32 %v1035_v14, %v881_v25  ;;  %v888_v30 = vmul.f32 %v1037_v26, %v856_v17  ;;  %vm894_vm9 = vweird.f32 %v1037_v26 }
 0x3c6   : > { %v912_v32 = vmax.f32 %v908_v28, 0.0  ;;  %vm895_vm11 = vmor %vm893_vm10, %vm894_vm9 }
 0x3c7   : > { %v886_v11 = vsel %vm885_vm8, %v1035_v14, %v882_v29  ;;  %v889_v44 = vmul.f32 %v1037_v26, %v888_v30 }
 0x3c8   : > { %916 = vst.msk [vmem:[%s1409_s17 + $0x8] sm:$0xff] %vm432_vm0, %v912_v32  ;;  %v899_v34 = vmul.f32 %v886_v11, %v1382_v15 }
 0x3c9   : > { %v890_v4 = vmul.f32 0.5, %v889_v44 }
 0x3ca   : > { %v904_v27 = vmul.f32 %v901_v47, %v899_v34 }
 0x3cb   : > { %v891_v36 = vsub.f32 1.5, %v890_v4 }
 0x3cc   : > { %v909_v38 = vadd.f32 %v906_v8, %v904_v27 }
 0x3cd   : > { %v892_v37 = vmul.f32 %v1037_v26, %v891_v36 }
 0x3ce   : > { %v913_v42 = vmax.f32 %v909_v38, 0.0 }
 0x3cf   : > { %v896_v41 = vsel %vm895_vm11, %v1037_v26, %v892_v37 }
 0x3d0   : > { %917 = vst.msk [vmem:[%s1409_s17 + $0x10] sm:$0xff] %vm432_vm0, %v913_v42  ;;  %v900_v43 = vmul.f32 %v896_v41, %v1388_v21 }
 0x3d2   : > { %v905_v46 = vmul.f32 %v901_v47, %v900_v43 }
 0x3d4   : > { %v910_v48 = vadd.f32 %v906_v8, %v905_v46 }
 0x3d6   : > { %v914_v49 = vmax.f32 %v910_v48, 0.0 }
 0x3d8   : > { %918 = vst.msk [vmem:[%s1409_s17 + $0x18] sm:$0xff] %vm432_vm0, %v914_v49 }
 0x3d9 PF: > { %s20_s13 = sadd.s32 1, %s1044_s13  }
 0x3da   : > { %p17_p5 = scmp.ge.s32.totalorder %s20_s13, 4  }
 0x3dc   :  { %19 = sbr.rel (!%p17_p5) target bundleno = 1 (0x1), region = 90 }

</bundles_post_ra>
